<compile_context>
chip_gen: v5e
topology: v5e:2x2
jax: 0.10.0
libtpu: 0.0.40
codegen_flags: <defaults>
</compile_context>

<pallas_src>
import jax
import jax.numpy as jnp
from jax.experimental import pallas as pl
from jax.experimental.pallas import tpu as pltpu


# ----------------------------- kernel ----------------------------------------

def fused_cfg_denoiser_kernel(cin_ref, cout_ref, cs_ref, wx_ref,
                              pu_ref, pc_ref, x_ref, out_ref):
    """Fused inner-model + CFG combine for one batch element.

    cin_ref:  SMEM (B,)   per-batch 1/sqrt(sigma^2+1)
    cout_ref: SMEM (B,)   per-batch sigma * c_in
    cs_ref:   SMEM (1,)   cond_scale
    wx_ref:   SMEM (C,C)  channel-mixing weights
    pu_ref:   SMEM (B,C)  conditioning bias, uncond half  (mean_S(uncond) @ Wc)
    pc_ref:   SMEM (B,C)  conditioning bias, cond half    (mean_S(cond)   @ Wc)
    x_ref:    VMEM (1,C,HW) latents      out_ref: VMEM (1,C,HW)
    """
    b = pl.program_id(0)
    c_in = cin_ref[b]
    c_out = cout_ref[b]
    cs = cs_ref[0]

    x = x_ref[0]                                   # (C, HW) -> vregs
    C = x.shape[0]

    rows = []
    for o in range(C):                             # static unroll: VPU MACs,
        # h_o = sum_c wx[o,c] * (x[c] * c_in), weights folded with c_in on the
        # scalar unit so the vector path is pure broadcast multiply-add.
        h_o = x[0:1, :] * (wx_ref[o, 0] * c_in)
        for c in range(1, C):
            h_o = h_o + x[c:c + 1, :] * (wx_ref[o, c] * c_in)

        x_o = x[o:o + 1, :]
        u_o = x_o + c_out * (h_o + pu_ref[b, o])   # inner_model(uncond half)
        c_o = x_o + c_out * (h_o + pc_ref[b, o])   # inner_model(cond half)
        rows.append(u_o + (c_o - u_o) * cs)        # CFG combine in registers

    out_ref[0] = jnp.concatenate(rows, axis=0)     # one lane-dense tile store


# ----------------------------- wrapper ----------------------------------------

def cfg_denoiser_forward(x, sigma, uncond, cond, cond_scale, wx, wc):
    """Pallas implementation of CFGDenoiser.forward.

    x:      (B, C, H, W)  float32 latents (NCHW, like PyTorch)
    sigma:  (B,)          float32 noise levels
    uncond: (B, S, D)     float32 unconditional embeddings
    cond:   (B, S, D)     float32 conditional embeddings
    cond_scale: python float / scalar
    """
    B, C, H, W = x.shape
    HW = H * W
    x_flat = x.reshape(B, C, HW)                   # free contiguous reshape

    # One-time prologue (tiny, per-batch): sigma scalings and conditioning
    # projection, hoisted out of the per-step hot loop and passed via SMEM.
    c_in = 1.0 / jnp.sqrt(sigma * sigma + 1.0)                  # (B,)
    c_out = sigma * c_in                                        # (B,)
    cproj_u = (jnp.mean(uncond, axis=1) @ wc).astype(jnp.float32)   # (B, C)
    cproj_c = (jnp.mean(cond, axis=1) @ wc).astype(jnp.float32)     # (B, C)
    cs = jnp.asarray([cond_scale], dtype=jnp.float32)

    smem = pl.BlockSpec(memory_space=pltpu.MemorySpace.SMEM)

    # NOTE: for real SD latent sizes (HW up to ~16K) split HW into a second
    # parallel grid axis and set vmem_limit_bytes (v7x has 64 MiB VMEM).
    out = pl.pallas_call(
        fused_cfg_denoiser_kernel,
        out_shape=jax.ShapeDtypeStruct((B, C, HW), jnp.float32),
        grid_spec=pltpu.PrefetchScalarGridSpec(
            num_scalar_prefetch=0,
            grid=(B,),
            in_specs=[
                smem,                                        # c_in   (B,)
                smem,                                        # c_out  (B,)
                smem,                                        # cond_scale (1,)
                smem,                                        # wx     (C,C)
                smem,                                        # cproj_uncond (B,C)
                smem,                                        # cproj_cond   (B,C)
                pl.BlockSpec((1, C, HW), lambda b: (b, 0, 0)),   # x
            ],
            out_specs=pl.BlockSpec((1, C, HW), lambda b: (b, 0, 0)),
        ),
        compiler_params=pltpu.CompilerParams(
            dimension_semantics=("parallel",)),
    )(c_in, c_out, cs, wx, cproj_u, cproj_c, x_flat)

    return out.reshape(B, C, H, W)


# ----------------------------- reference --------------------------------------

def _inner_model_ref(x_in, sigma_in, cond_in, wx, wc):
    c_in = 1.0 / jnp.sqrt(sigma_in ** 2 + 1.0)                # (2B,)
    c_out = sigma_in * c_in
    h = jnp.einsum('oc,bch->boh', wx, x_in * c_in[:, None, None])
    cproj = jnp.mean(cond_in, axis=1) @ wc                    # (2B, C)
    return x_in + c_out[:, None, None] * (h + cproj[:, :, None])


def cfg_denoiser_ref(x, sigma, uncond, cond, cond_scale, wx, wc):
    # Mirrors the PyTorch module literally: doubled batch, inner model, chunk.
    B, C, H, W = x.shape
    HW = H * W
    x_in = jnp.concatenate([x, x], axis=0).reshape(2 * B, C, HW)
    sigma_in = jnp.concatenate([sigma, sigma], axis=0)
    cond_in = jnp.concatenate([uncond, cond], axis=0)
    out = _inner_model_ref(x_in, sigma_in, cond_in, wx, wc)
    u, c = out[:B], out[B:]
    return (u + (c - u) * cond_scale).reshape(B, C, H, W)


# ----------------------------- main -------------------------------------------

if __name__ == "__main__":
    B, C, H, W = 2, 4, 16, 16
    S, D = 8, 32
    cond_scale = 7.5

    key = jax.random.PRNGKey(0)
    kx, ks, ku, kc, kwx, kwc = jax.random.split(key, 6)

    x = jax.random.normal(kx, (B, C, H, W), dtype=jnp.float32)
    sigma = jax.random.uniform(ks, (B,), dtype=jnp.float32, minval=0.5, maxval=5.0)
    uncond = jax.random.normal(ku, (B, S, D), dtype=jnp.float32)
    cond = jax.random.normal(kc, (B, S, D), dtype=jnp.float32)

    # deterministic synthetic "inner model" weights
    # TODO(synk): the real inner_model is an external SD UNet checkpoint; it is
    # replaced here by a sigma-conditioned linear denoiser of matching shapes.
    wx = jnp.eye(C, dtype=jnp.float32) + 0.05 * jax.random.normal(kwx, (C, C), dtype=jnp.float32)
    wc = 0.05 * jax.random.normal(kwc, (D, C), dtype=jnp.float32)

    out = cfg_denoiser_forward(x, sigma, uncond, cond, cond_scale, wx, wc)
    out = jax.block_until_ready(out)

    ref = cfg_denoiser_ref(x, sigma, uncond, cond, cond_scale, wx, wc)
    assert out.shape == (B, C, H, W)
    assert jnp.allclose(out, ref, atol=1e-4, rtol=1e-4), "mismatch vs reference"

    print("KERNEL_OK")
</pallas_src>

<mosaic_0001>
module attributes {stable_mosaic.version = 11 : i64} {
  func.func @fused_cfg_denoiser_kernel(%arg0: i32, %arg1: memref<2xf32, #tpu.memory_space<smem>>, %arg2: memref<2xf32, #tpu.memory_space<smem>>, %arg3: memref<1xf32, #tpu.memory_space<smem>>, %arg4: memref<4x4xf32, #tpu.memory_space<smem>>, %arg5: memref<2x4xf32, #tpu.memory_space<smem>>, %arg6: memref<2x4xf32, #tpu.memory_space<smem>>, %arg7: memref<1x4x256xf32, #tpu.memory_space<vmem>>, %arg8: memref<1x4x256xf32, #tpu.memory_space<vmem>>) attributes {dimension_semantics = [#tpu.dimension_semantics<parallel>], iteration_bounds = array<i64: 2>, scalar_prefetch = 0 : i64, scratch_operands = 0 : i64, tpu.core_type = #tpu.core_type<tc>, window_params = [{transform_indices = @transform_0, window_bounds = array<i64: 2>}, {transform_indices = @transform_1, window_bounds = array<i64: 2>}, {transform_indices = @transform_2, window_bounds = array<i64: 1>}, {transform_indices = @transform_3, window_bounds = array<i64: 4, 4>}, {transform_indices = @transform_4, window_bounds = array<i64: 2, 4>}, {transform_indices = @transform_5, window_bounds = array<i64: 2, 4>}, {transform_indices = @transform_6, window_bounds = array<i64: 1, 4, 256>}, {transform_indices = @transform_7, window_bounds = array<i64: 1, 4, 256>}]} {
    %0 = arith.index_cast %arg0 : i32 to index
    %1 = memref.load %arg1[%0] : memref<2xf32, #tpu.memory_space<smem>>
    %2 = arith.index_cast %arg0 : i32 to index
    %3 = memref.load %arg2[%2] : memref<2xf32, #tpu.memory_space<smem>>
    %c0 = arith.constant 0 : index
    %4 = memref.load %arg3[%c0] : memref<1xf32, #tpu.memory_space<smem>>
    %c0_0 = arith.constant 0 : index
    %c0_1 = arith.constant 0 : index
    %c0_2 = arith.constant 0 : index
    %5 = vector.load %arg7[%c0_0, %c0_1, %c0_2] : memref<1x4x256xf32, #tpu.memory_space<vmem>>, vector<1x4x256xf32>
    %6 = vector.shape_cast %5 : vector<1x4x256xf32> to vector<4x256xf32>
    %7 = vector.extract_strided_slice %6 {offsets = [0, 0], sizes = [1, 256], strides = [1, 1]} : vector<4x256xf32> to vector<1x256xf32>
    %c0_3 = arith.constant 0 : index
    %c0_4 = arith.constant 0 : index
    %8 = memref.load %arg4[%c0_3, %c0_4] : memref<4x4xf32, #tpu.memory_space<smem>>
    %9 = arith.mulf %8, %1 : f32
    %10 = vector.broadcast %9 : f32 to vector<1x256xf32>
    %11 = arith.mulf %7, %10 : vector<1x256xf32>
    %12 = vector.extract_strided_slice %6 {offsets = [1, 0], sizes = [1, 256], strides = [1, 1]} : vector<4x256xf32> to vector<1x256xf32>
    %c0_5 = arith.constant 0 : index
    %c1 = arith.constant 1 : index
    %13 = memref.load %arg4[%c0_5, %c1] : memref<4x4xf32, #tpu.memory_space<smem>>
    %14 = arith.mulf %13, %1 : f32
    %15 = vector.broadcast %14 : f32 to vector<1x256xf32>
    %16 = arith.mulf %12, %15 : vector<1x256xf32>
    %17 = arith.addf %11, %16 : vector<1x256xf32>
    %18 = vector.extract_strided_slice %6 {offsets = [2, 0], sizes = [1, 256], strides = [1, 1]} : vector<4x256xf32> to vector<1x256xf32>
    %c0_6 = arith.constant 0 : index
    %c2 = arith.constant 2 : index
    %19 = memref.load %arg4[%c0_6, %c2] : memref<4x4xf32, #tpu.memory_space<smem>>
    %20 = arith.mulf %19, %1 : f32
    %21 = vector.broadcast %20 : f32 to vector<1x256xf32>
    %22 = arith.mulf %18, %21 : vector<1x256xf32>
    %23 = arith.addf %17, %22 : vector<1x256xf32>
    %24 = vector.extract_strided_slice %6 {offsets = [3, 0], sizes = [1, 256], strides = [1, 1]} : vector<4x256xf32> to vector<1x256xf32>
    %c0_7 = arith.constant 0 : index
    %c3 = arith.constant 3 : index
    %25 = memref.load %arg4[%c0_7, %c3] : memref<4x4xf32, #tpu.memory_space<smem>>
    %26 = arith.mulf %25, %1 : f32
    %27 = vector.broadcast %26 : f32 to vector<1x256xf32>
    %28 = arith.mulf %24, %27 : vector<1x256xf32>
    %29 = arith.addf %23, %28 : vector<1x256xf32>
    %30 = vector.extract_strided_slice %6 {offsets = [0, 0], sizes = [1, 256], strides = [1, 1]} : vector<4x256xf32> to vector<1x256xf32>
    %31 = arith.index_cast %arg0 : i32 to index
    %c0_8 = arith.constant 0 : index
    %32 = memref.load %arg5[%31, %c0_8] : memref<2x4xf32, #tpu.memory_space<smem>>
    %33 = vector.broadcast %32 : f32 to vector<1x256xf32>
    %34 = arith.addf %29, %33 : vector<1x256xf32>
    %35 = vector.broadcast %3 : f32 to vector<1x256xf32>
    %36 = arith.mulf %35, %34 : vector<1x256xf32>
    %37 = arith.addf %30, %36 : vector<1x256xf32>
    %38 = arith.index_cast %arg0 : i32 to index
    %c0_9 = arith.constant 0 : index
    %39 = memref.load %arg6[%38, %c0_9] : memref<2x4xf32, #tpu.memory_space<smem>>
    %40 = vector.broadcast %39 : f32 to vector<1x256xf32>
    %41 = arith.addf %29, %40 : vector<1x256xf32>
    %42 = vector.broadcast %3 : f32 to vector<1x256xf32>
    %43 = arith.mulf %42, %41 : vector<1x256xf32>
    %44 = arith.addf %30, %43 : vector<1x256xf32>
    %45 = arith.subf %44, %37 : vector<1x256xf32>
    %46 = vector.broadcast %4 : f32 to vector<1x256xf32>
    %47 = arith.mulf %45, %46 : vector<1x256xf32>
    %48 = arith.addf %37, %47 : vector<1x256xf32>
    %49 = vector.extract_strided_slice %6 {offsets = [0, 0], sizes = [1, 256], strides = [1, 1]} : vector<4x256xf32> to vector<1x256xf32>
    %c1_10 = arith.constant 1 : index
    %c0_11 = arith.constant 0 : index
    %50 = memref.load %arg4[%c1_10, %c0_11] : memref<4x4xf32, #tpu.memory_space<smem>>
    %51 = arith.mulf %50, %1 : f32
    %52 = vector.broadcast %51 : f32 to vector<1x256xf32>
    %53 = arith.mulf %49, %52 : vector<1x256xf32>
    %54 = vector.extract_strided_slice %6 {offsets = [1, 0], sizes = [1, 256], strides = [1, 1]} : vector<4x256xf32> to vector<1x256xf32>
    %c1_12 = arith.constant 1 : index
    %c1_13 = arith.constant 1 : index
    %55 = memref.load %arg4[%c1_12, %c1_13] : memref<4x4xf32, #tpu.memory_space<smem>>
    %56 = arith.mulf %55, %1 : f32
    %57 = vector.broadcast %56 : f32 to vector<1x256xf32>
    %58 = arith.mulf %54, %57 : vector<1x256xf32>
    %59 = arith.addf %53, %58 : vector<1x256xf32>
    %60 = vector.extract_strided_slice %6 {offsets = [2, 0], sizes = [1, 256], strides = [1, 1]} : vector<4x256xf32> to vector<1x256xf32>
    %c1_14 = arith.constant 1 : index
    %c2_15 = arith.constant 2 : index
    %61 = memref.load %arg4[%c1_14, %c2_15] : memref<4x4xf32, #tpu.memory_space<smem>>
    %62 = arith.mulf %61, %1 : f32
    %63 = vector.broadcast %62 : f32 to vector<1x256xf32>
    %64 = arith.mulf %60, %63 : vector<1x256xf32>
    %65 = arith.addf %59, %64 : vector<1x256xf32>
    %66 = vector.extract_strided_slice %6 {offsets = [3, 0], sizes = [1, 256], strides = [1, 1]} : vector<4x256xf32> to vector<1x256xf32>
    %c1_16 = arith.constant 1 : index
    %c3_17 = arith.constant 3 : index
    %67 = memref.load %arg4[%c1_16, %c3_17] : memref<4x4xf32, #tpu.memory_space<smem>>
    %68 = arith.mulf %67, %1 : f32
    %69 = vector.broadcast %68 : f32 to vector<1x256xf32>
    %70 = arith.mulf %66, %69 : vector<1x256xf32>
    %71 = arith.addf %65, %70 : vector<1x256xf32>
    %72 = vector.extract_strided_slice %6 {offsets = [1, 0], sizes = [1, 256], strides = [1, 1]} : vector<4x256xf32> to vector<1x256xf32>
    %73 = arith.index_cast %arg0 : i32 to index
    %c1_18 = arith.constant 1 : index
    %74 = memref.load %arg5[%73, %c1_18] : memref<2x4xf32, #tpu.memory_space<smem>>
    %75 = vector.broadcast %74 : f32 to vector<1x256xf32>
    %76 = arith.addf %71, %75 : vector<1x256xf32>
    %77 = vector.broadcast %3 : f32 to vector<1x256xf32>
    %78 = arith.mulf %77, %76 : vector<1x256xf32>
    %79 = arith.addf %72, %78 : vector<1x256xf32>
    %80 = arith.index_cast %arg0 : i32 to index
    %c1_19 = arith.constant 1 : index
    %81 = memref.load %arg6[%80, %c1_19] : memref<2x4xf32, #tpu.memory_space<smem>>
    %82 = vector.broadcast %81 : f32 to vector<1x256xf32>
    %83 = arith.addf %71, %82 : vector<1x256xf32>
    %84 = vector.broadcast %3 : f32 to vector<1x256xf32>
    %85 = arith.mulf %84, %83 : vector<1x256xf32>
    %86 = arith.addf %72, %85 : vector<1x256xf32>
    %87 = arith.subf %86, %79 : vector<1x256xf32>
    %88 = vector.broadcast %4 : f32 to vector<1x256xf32>
    %89 = arith.mulf %87, %88 : vector<1x256xf32>
    %90 = arith.addf %79, %89 : vector<1x256xf32>
    %91 = vector.extract_strided_slice %6 {offsets = [0, 0], sizes = [1, 256], strides = [1, 1]} : vector<4x256xf32> to vector<1x256xf32>
    %c2_20 = arith.constant 2 : index
    %c0_21 = arith.constant 0 : index
    %92 = memref.load %arg4[%c2_20, %c0_21] : memref<4x4xf32, #tpu.memory_space<smem>>
    %93 = arith.mulf %92, %1 : f32
    %94 = vector.broadcast %93 : f32 to vector<1x256xf32>
    %95 = arith.mulf %91, %94 : vector<1x256xf32>
    %96 = vector.extract_strided_slice %6 {offsets = [1, 0], sizes = [1, 256], strides = [1, 1]} : vector<4x256xf32> to vector<1x256xf32>
    %c2_22 = arith.constant 2 : index
    %c1_23 = arith.constant 1 : index
    %97 = memref.load %arg4[%c2_22, %c1_23] : memref<4x4xf32, #tpu.memory_space<smem>>
    %98 = arith.mulf %97, %1 : f32
    %99 = vector.broadcast %98 : f32 to vector<1x256xf32>
    %100 = arith.mulf %96, %99 : vector<1x256xf32>
    %101 = arith.addf %95, %100 : vector<1x256xf32>
    %102 = vector.extract_strided_slice %6 {offsets = [2, 0], sizes = [1, 256], strides = [1, 1]} : vector<4x256xf32> to vector<1x256xf32>
    %c2_24 = arith.constant 2 : index
    %c2_25 = arith.constant 2 : index
    %103 = memref.load %arg4[%c2_24, %c2_25] : memref<4x4xf32, #tpu.memory_space<smem>>
    %104 = arith.mulf %103, %1 : f32
    %105 = vector.broadcast %104 : f32 to vector<1x256xf32>
    %106 = arith.mulf %102, %105 : vector<1x256xf32>
    %107 = arith.addf %101, %106 : vector<1x256xf32>
    %108 = vector.extract_strided_slice %6 {offsets = [3, 0], sizes = [1, 256], strides = [1, 1]} : vector<4x256xf32> to vector<1x256xf32>
    %c2_26 = arith.constant 2 : index
    %c3_27 = arith.constant 3 : index
    %109 = memref.load %arg4[%c2_26, %c3_27] : memref<4x4xf32, #tpu.memory_space<smem>>
    %110 = arith.mulf %109, %1 : f32
    %111 = vector.broadcast %110 : f32 to vector<1x256xf32>
    %112 = arith.mulf %108, %111 : vector<1x256xf32>
    %113 = arith.addf %107, %112 : vector<1x256xf32>
    %114 = vector.extract_strided_slice %6 {offsets = [2, 0], sizes = [1, 256], strides = [1, 1]} : vector<4x256xf32> to vector<1x256xf32>
    %115 = arith.index_cast %arg0 : i32 to index
    %c2_28 = arith.constant 2 : index
    %116 = memref.load %arg5[%115, %c2_28] : memref<2x4xf32, #tpu.memory_space<smem>>
    %117 = vector.broadcast %116 : f32 to vector<1x256xf32>
    %118 = arith.addf %113, %117 : vector<1x256xf32>
    %119 = vector.broadcast %3 : f32 to vector<1x256xf32>
    %120 = arith.mulf %119, %118 : vector<1x256xf32>
    %121 = arith.addf %114, %120 : vector<1x256xf32>
    %122 = arith.index_cast %arg0 : i32 to index
    %c2_29 = arith.constant 2 : index
    %123 = memref.load %arg6[%122, %c2_29] : memref<2x4xf32, #tpu.memory_space<smem>>
    %124 = vector.broadcast %123 : f32 to vector<1x256xf32>
    %125 = arith.addf %113, %124 : vector<1x256xf32>
    %126 = vector.broadcast %3 : f32 to vector<1x256xf32>
    %127 = arith.mulf %126, %125 : vector<1x256xf32>
    %128 = arith.addf %114, %127 : vector<1x256xf32>
    %129 = arith.subf %128, %121 : vector<1x256xf32>
    %130 = vector.broadcast %4 : f32 to vector<1x256xf32>
    %131 = arith.mulf %129, %130 : vector<1x256xf32>
    %132 = arith.addf %121, %131 : vector<1x256xf32>
    %133 = vector.extract_strided_slice %6 {offsets = [0, 0], sizes = [1, 256], strides = [1, 1]} : vector<4x256xf32> to vector<1x256xf32>
    %c3_30 = arith.constant 3 : index
    %c0_31 = arith.constant 0 : index
    %134 = memref.load %arg4[%c3_30, %c0_31] : memref<4x4xf32, #tpu.memory_space<smem>>
    %135 = arith.mulf %134, %1 : f32
    %136 = vector.broadcast %135 : f32 to vector<1x256xf32>
    %137 = arith.mulf %133, %136 : vector<1x256xf32>
    %138 = vector.extract_strided_slice %6 {offsets = [1, 0], sizes = [1, 256], strides = [1, 1]} : vector<4x256xf32> to vector<1x256xf32>
    %c3_32 = arith.constant 3 : index
    %c1_33 = arith.constant 1 : index
    %139 = memref.load %arg4[%c3_32, %c1_33] : memref<4x4xf32, #tpu.memory_space<smem>>
    %140 = arith.mulf %139, %1 : f32
    %141 = vector.broadcast %140 : f32 to vector<1x256xf32>
    %142 = arith.mulf %138, %141 : vector<1x256xf32>
    %143 = arith.addf %137, %142 : vector<1x256xf32>
    %144 = vector.extract_strided_slice %6 {offsets = [2, 0], sizes = [1, 256], strides = [1, 1]} : vector<4x256xf32> to vector<1x256xf32>
    %c3_34 = arith.constant 3 : index
    %c2_35 = arith.constant 2 : index
    %145 = memref.load %arg4[%c3_34, %c2_35] : memref<4x4xf32, #tpu.memory_space<smem>>
    %146 = arith.mulf %145, %1 : f32
    %147 = vector.broadcast %146 : f32 to vector<1x256xf32>
    %148 = arith.mulf %144, %147 : vector<1x256xf32>
    %149 = arith.addf %143, %148 : vector<1x256xf32>
    %150 = vector.extract_strided_slice %6 {offsets = [3, 0], sizes = [1, 256], strides = [1, 1]} : vector<4x256xf32> to vector<1x256xf32>
    %c3_36 = arith.constant 3 : index
    %c3_37 = arith.constant 3 : index
    %151 = memref.load %arg4[%c3_36, %c3_37] : memref<4x4xf32, #tpu.memory_space<smem>>
    %152 = arith.mulf %151, %1 : f32
    %153 = vector.broadcast %152 : f32 to vector<1x256xf32>
    %154 = arith.mulf %150, %153 : vector<1x256xf32>
    %155 = arith.addf %149, %154 : vector<1x256xf32>
    %156 = vector.extract_strided_slice %6 {offsets = [3, 0], sizes = [1, 256], strides = [1, 1]} : vector<4x256xf32> to vector<1x256xf32>
    %157 = arith.index_cast %arg0 : i32 to index
    %c3_38 = arith.constant 3 : index
    %158 = memref.load %arg5[%157, %c3_38] : memref<2x4xf32, #tpu.memory_space<smem>>
    %159 = vector.broadcast %158 : f32 to vector<1x256xf32>
    %160 = arith.addf %155, %159 : vector<1x256xf32>
    %161 = vector.broadcast %3 : f32 to vector<1x256xf32>
    %162 = arith.mulf %161, %160 : vector<1x256xf32>
    %163 = arith.addf %156, %162 : vector<1x256xf32>
    %164 = arith.index_cast %arg0 : i32 to index
    %c3_39 = arith.constant 3 : index
    %165 = memref.load %arg6[%164, %c3_39] : memref<2x4xf32, #tpu.memory_space<smem>>
    %166 = vector.broadcast %165 : f32 to vector<1x256xf32>
    %167 = arith.addf %155, %166 : vector<1x256xf32>
    %168 = vector.broadcast %3 : f32 to vector<1x256xf32>
    %169 = arith.mulf %168, %167 : vector<1x256xf32>
    %170 = arith.addf %156, %169 : vector<1x256xf32>
    %171 = arith.subf %170, %163 : vector<1x256xf32>
    %172 = vector.broadcast %4 : f32 to vector<1x256xf32>
    %173 = arith.mulf %171, %172 : vector<1x256xf32>
    %174 = arith.addf %163, %173 : vector<1x256xf32>
    %175 = tpu.concatenate %48, %90, %132, %174 in 0 : vector<1x256xf32>, vector<1x256xf32>, vector<1x256xf32>, vector<1x256xf32> -> vector<4x256xf32>
    %c0_40 = arith.constant 0 : index
    %c0_41 = arith.constant 0 : index
    %c0_42 = arith.constant 0 : index
    %176 = vector.load %arg8[%c0_40, %c0_41, %c0_42] : memref<1x4x256xf32, #tpu.memory_space<vmem>>, vector<1x4x256xf32>
    %177 = vector.shape_cast %176 : vector<1x4x256xf32> to vector<4x256xf32>
    %178 = vector.shape_cast %175 : vector<4x256xf32> to vector<1x4x256xf32>
    tpu.vector_store %arg8[%c0_40, %c0_41, %c0_42], %178 {strides = array<i32>} : memref<1x4x256xf32, #tpu.memory_space<vmem>>, vector<1x4x256xf32>,
    return
  }
  func.func @transform_0(%arg0: i32) -> i32 {
    %c0_i32 = arith.constant 0 : i32
    %c0_i32_0 = arith.constant 0 : i32
    return %c0_i32 : i32
  }
  func.func @transform_1(%arg0: i32) -> i32 {
    %c0_i32 = arith.constant 0 : i32
    %c0_i32_0 = arith.constant 0 : i32
    return %c0_i32 : i32
  }
  func.func @transform_2(%arg0: i32) -> i32 {
    %c0_i32 = arith.constant 0 : i32
    %c0_i32_0 = arith.constant 0 : i32
    return %c0_i32 : i32
  }
  func.func @transform_3(%arg0: i32) -> (i32, i32) {
    %c0_i32 = arith.constant 0 : i32
    %c0_i32_0 = arith.constant 0 : i32
    %c0_i32_1 = arith.constant 0 : i32
    return %c0_i32, %c0_i32_0 : i32, i32
  }
  func.func @transform_4(%arg0: i32) -> (i32, i32) {
    %c0_i32 = arith.constant 0 : i32
    %c0_i32_0 = arith.constant 0 : i32
    %c0_i32_1 = arith.constant 0 : i32
    return %c0_i32, %c0_i32_0 : i32, i32
  }
  func.func @transform_5(%arg0: i32) -> (i32, i32) {
    %c0_i32 = arith.constant 0 : i32
    %c0_i32_0 = arith.constant 0 : i32
    %c0_i32_1 = arith.constant 0 : i32
    return %c0_i32, %c0_i32_0 : i32, i32
  }
  func.func @transform_6(%arg0: i32) -> (i32, i32, i32) {
    %c0_i32 = arith.constant 0 : i32
    %c0_i32_0 = arith.constant 0 : i32
    %c0_i32_1 = arith.constant 0 : i32
    return %arg0, %c0_i32, %c0_i32_0 : i32, i32, i32
  }
  func.func @transform_7(%arg0: i32) -> (i32, i32, i32) {
    %c0_i32 = arith.constant 0 : i32
    %c0_i32_0 = arith.constant 0 : i32
    %c0_i32_1 = arith.constant 0 : i32
    return %arg0, %c0_i32, %c0_i32_0 : i32, i32, i32
  }
}

</mosaic_0001>

<bundles_post_ra>
// kernel: tpu_custom_call.1
= control target key start
LH: loop header
LB: loop body
LE: loop exit
PB: predicated region body
PF: predicated region fallthrough
CT: control target
= control target key end

     0   :  { %s1437_s0 = inlined_call_operand.hbm [shape: f32[2], index: 0, kind: input, shape index: {}]   ;;  %s1438_s1 = inlined_call_operand.hbm [shape: f32[2], index: 1, kind: input, shape index: {}]   ;;  %s1439_s2 = inlined_call_operand.<no memory space> [shape: f32[1], index: 2, kind: input, shape index: {}]   ;;  %s1440_s3 = inlined_call_operand.hbm [shape: f32[4,4], index: 3, kind: input, shape index: {}]   ;;  %s1441_s4 = inlined_call_operand.vmem [shape: f32[2,4], index: 4, kind: input, shape index: {}]   ;;  %s1442_s5 = inlined_call_operand.vmem [shape: f32[2,4], index: 5, kind: input, shape index: {}]   ;;  %s1443_s6 = inlined_call_operand.hbm [shape: f32[2,4,256], index: 6, kind: input, shape index: {}]   ;;  %s1444_s7 = inlined_call_operand.hbm [shape: f32[2,4,256], index: 7, kind: output, shape index: {}]  }
   0x1   :  { %1446 = sst [smem:[#allocation22_spill]] %s1437_s0 }
   0x2   :  { %1447 = sst [smem:[#allocation23_spill]] %s1438_s1 }
   0x3   :  { %1448 = sst [smem:[#allocation24_spill]] %s1440_s3 }
   0x4   :  { %1449 = sst [smem:[#allocation25_spill]] %s1441_s4 }
   0x5   :  { %1450 = sst [smem:[#allocation26_spill]] %s1442_s5 }
   0x6   :  { %12 = sst [smem:[#allocation2]] %s1439_s2 }
   0x7   :  { %13 = vsyncpa [#allocation6], 0 }
   0x8   :  { %14 = vsyncpa [#allocation9], 0 }
   0x9   :  { %15 = vsyncpa [#allocation7], 0 }
   0xa   :  { %16 = vsyncpa [#allocation13], 0 }
   0xb   :  { %17 = vsyncpa [#allocation4], 0 }
   0xc   :  { %19 = vsyncpa [#allocation4 + $0x1], 0 }
   0xd   :  { %20 = vsyncpa [#allocation5], 0 }
   0xe   :  { %22 = vsyncpa [#allocation5 + $0x1], 0  ;;  %s1131_s26 = smov 0   ;;  %s1133_s27 = smov 0  }
   0xf   :  { %s1135_s28 = smov 0   ;;  %s1137_s29 = smov 0  }
  0x10 LB: > { %s1451_s1 = sld [smem:[#allocation23_spill]]  ;;  %s1155_s9 = sadd.s32 4294967295, %s1081_s29   ;;  %s1081_s29 = sphi %s1137_s29, %s1467_s29   ;;  %s1077_s28 = sphi %s1135_s28, %s1466_s28   ;;  %s1073_s27 = sphi %s1133_s27, %s1465_s27   ;;  %s1069_s26 = sphi %s1131_s26, %s1464_s26  }
  0x11   : > { %p744_p0 = scmp.ge.s32.totalorder %s1081_s29, 1  ;;  %p175_p1 = scmp.eq.s32.totalorder %s1155_s9, 0 }
  0x12   : > { %p211_p2 = scmp.lt.s32.totalorder %s1081_s29, 3  ;;  %s1453_s0 = sld [smem:[#allocation22_spill]] }
  0x13   : > { %s1454_s3 = sld [smem:[#allocation24_spill]]  ;;  %s1083_s21 = smov [#allocation8]  }
  0x14   : > { %p1160_p3 = pnand %p744_p0, %p211_p2  ;;  %s1456_s4 = sld [smem:[#allocation25_spill]] }
  0x15   : > { %s1084_s22 = smov [#allocation3]   ;;  %s1085_s23 = smov [#allocation10]  }
  0x16   : > { %s233_s8 = sshll.u32 %s1451_s1, 4  ;;  %p821_p5 = pneg %p1160_p3  ;;  %s234_s8 = int_to_ptr.hbm [resolvable:$true] %s233_s8 }
  0x17   : > { %s1086_s24 = smov [#allocation11]   ;;  %s1457_s5 = sld [smem:[#allocation26_spill]] }
  0x18   : > { %s223_s13 = sshll.u32 %s1453_s0, 4  ;;  %p1175_p6 = pnand %p821_p5, %p175_p1  ;;  %s224_s13 = int_to_ptr.hbm [resolvable:$true] %s223_s13 }
  0x19   : > { %s246_s16 = sshll.u32 %s1454_s3, 4  ;;  %s743_s11 = sadd.s32 4294967294, %s1081_s29   ;;  %s247_s16 = int_to_ptr.hbm [resolvable:$true] %s246_s16 }
  0x1a   : > { %s256_s20 = sshll.u32 %s1456_s4, 4  ;;  %s1197_s12 = sadd.s32 1, %s1081_s29   ;;  %s257_s20 = int_to_ptr.vmem [resolvable:$true] %s256_s20 }
  0x1b   : > { %827 = dma.hbm_to_smem (!%p1175_p6), %s234_s8, 16, %s1083_s21, [#allocation9]  }
  0x1c   : > { %824 = dma.hbm_to_smem (!%p1175_p6), %s224_s13, 16, %s1084_s22, [#allocation6]  }
  0x1d   : > { %830 = dma.hbm_to_smem (!%p1175_p6), %s247_s16, 64, %s1085_s23, [#allocation9]  }
  0x1e   : > { %833 = dma.vmem_to_smem (!%p1175_p6), %s257_s20, 32, %s1086_s24, [#allocation7]  }
  0x1f   : > { %s266_s30 = sshll.u32 %s1457_s5, 4  ;;  %s1087_s8 = smov [#allocation12]   ;;  %s267_s30 = int_to_ptr.vmem [resolvable:$true] %s266_s30 }
  0x20   : > { %836 = dma.vmem_to_smem (!%p1175_p6), %s267_s30, 32, %s1087_s8, [#allocation13]  }
  0x21   : > { %s161_s13 = sadd.s32 1, %s1077_s28  ;;  %s158_s14 = ssub.s32 %s1081_s29, %s1197_s12 }
  0x22   : > { %p168_p7 = scmp.ne.s32.totalorder %s1077_s28, %s1073_s27  ;;  %p159_p8 = scmp.eq.s32.totalorder %s158_s14, 0 }
  0x23   : > { %p169_p9 = scmp.eq.s32.totalorder %s1081_s29, 0  ;;  %p174_p10 = scmp.ne.s32.totalorder %s1073_s27, %s1069_s26 }
  0x24   : > { %p198_p11 = scmp.eq.s32.totalorder %s1155_s9, 1  ;;  %p204_p0 = scmp.eq.s32.totalorder %s743_s11, 1 }
  0x25   : > { %s1209_s15 = scalar_select %p159_p8, %s1077_s28, %s161_s13  }
  0x26   : > { %p1213_p12 = por %p175_p1, %p174_p10  ;;  %p1217_p13 = por %p198_p11, %p168_p7 }
  0x27   : > { %p170_p2 = por %p169_p9, %p168_p7  ;;  %s277_s18 = sand.u32 1, %s1077_s28  }
  0x28   : > { %p1222_p5 = por %p204_p0, %p174_p10  ;;  %p850_p6 = scmp.lt.s32.totalorder %s1081_s29, 2 }
  0x29   : > { %s751_s20 = sshll.u32 %s277_s18, 3  ;;  %s795_s21 = sshll.u32 %s1081_s29, 3 }
  0x2a   : > { %s286_s24 = scalar_lea.hbm %s1443_s6, %s795_s21  ;;  %s281_s2 = scalar_lea.vmem [#allocation14], %s751_s20 }
  0x2b   : > { %s288_s25 = sshll.u32 %s286_s24, 4  ;;  %s290_s30 = sshll.u32 %s281_s2, 4  ;;  %s289_s25 = int_to_ptr.hbm [resolvable:$true] %s288_s25  ;;  %s291_s30 = int_to_ptr.vmem [resolvable:$true] %s290_s30 }
  0x2c   : > { %p1231_p8 = pnand %p850_p6, %p170_p2  ;;  %s278_s11 = scalar_lea.sflag [#allocation4], %s277_s18 }
  0x2d   : > { %s969_s13 = sshra.s32 %s289_s25, 4  ;;  %s976_s20 = scalar_lea.hbm %s1443_s6, 16  ;;  %s970_s13 = int_to_ptr.hbm [resolvable:$true] %s969_s13 }
  0x2e   : > { %s971_s14 = scalar_lea.hbm %s970_s13, 8  ;;  %p973_p9 = pneg %p1231_p8 }
  0x2f   : > { %p972_p7 = scmp.ne.s32.totalorder %s970_s13, %s971_s14  ;;  %p977_p0 = scmp.lt.s32.totalorder %s970_s13, %s1443_s6 }
  0x30   : > { %p978_p2 = scmp.lt.s32.totalorder %s976_s20, %s971_s14 }
  0x31   : > { %p974_p10 = pnand %p973_p9, %p972_p7 }
  0x32   : > { %p979_p6 = por %p978_p2, %p977_p0 }
  0x33   : > { %p975_p11 = pneg %p974_p10 }
  0x35   : > { %p980_p4 = pnand %p979_p6, %p975_p11 }
  0x37   : > { %983 = shalt.err (!%p980_p4)
}
  0x38   : > { %840 = dma.hbm_to_vmem [thread:$0]  (!%p1231_p8), %s289_s25, 128, %s291_s30, %s278_s11  }
  0x39   : > { %299 = sbr.rel (%p1160_p3) target bundleno = 139 (0x8b), region = 48 }
  0x3e   : > { %1044 = dma.done.wait (%p175_p1), [#allocation6], 16  }
  0x3f   : > { %1046 = vsyncadd (%p175_p1), [#allocation6], 4294967280 }
  0x40   : > { %1048 = dma.done.wait (%p175_p1), [#allocation9], 80  }
  0x41   : > { %1050 = vsyncadd (%p175_p1), [#allocation9], 4294967216 }
  0x42   : > { %1052 = dma.done.wait (%p175_p1), [#allocation7], 32  }
  0x43   : > { %1054 = vsyncadd (%p175_p1), [#allocation7], 4294967264 }
  0x44   : > { %1056 = dma.done.wait (%p175_p1), [#allocation13], 32  }
  0x45   : > { %1058 = vsyncadd (%p175_p1), [#allocation13], 4294967264  ;;  %s1264_s10 = sand.u32 1, %s1073_s27  }
  0x46   : > { %s1445_s18 = sshll.u32 %s1264_s10, 3  ;;  %s327_s25 = scalar_lea.sflag [#allocation4], %s1264_s10 }
  0x47   : > { %s330_s2 = scalar_lea.vmem [#allocation14], %s1445_s18 }
  0x48   : > { %1060 = dma.done.wait (%p1213_p12), %s327_s25, 128  }
  0x49   : > { %1062 = vsyncadd (%p1213_p12), %s327_s25, 4294967168 }
  0x4a   : > { %336 = sfence }
  0x4b   : > { %s1275_s30 = sld [smem:[#allocation3 + %s1155_s9]]  ;;  %s1281_s21 = sshll.u32 %s1155_s9, 7  ;;  %v1295_v1 = vld [vmem:[%s330_s2] sm:$0xff]  ;;  %vm587_vm0 = vcmask 1040384   ;;  %vm590_vm1 = vcmask 1041408   ;;  %vm593_vm2 = vcmask 1042432  }
  0x4c   : > { %s1278_s8 = sld [smem:[#allocation8 + %s1155_s9]]  ;;  %s445_s23 = sadd.s32 1, %s1281_s21  ;;  %vm599_vm3 = vcmask 1043456  }
  0x4d   : > { %s367_s11 = sld [smem:[#allocation10]] }
  0x4e   : > { %s762_s13 = sld [smem:[#allocation10 + $0x1]] }
  0x4f   : > { %s764_s14 = sld [smem:[#allocation10 + $0x2]] }
  0x50   : > { %s766_s16 = sld [smem:[#allocation10 + $0x3]] }
  0x51   : > { %s1284_s22 = sld [smem:[#allocation11 + %s1281_s21]] }
  0x52   : > { %s1287_s20 = sld [smem:[#allocation12 + %s1281_s21]]  ;;  %v1346_v31 = vstv %s1278_s8 }
  0x53   : > { %s368_s24 = smul.f32 %s367_s11, %s1275_s30  ;;  %s769_s25 = sld [smem:[#allocation10 + $0x80]] }
  0x54   : > { %s372_s18 = smul.f32 %s762_s13, %s1275_s30  ;;  %s770_s0 = sld [smem:[#allocation10 + $0x81]] }
  0x55   : > { %v369_v0 = vstv %s368_s24  ;;  %s381_s1 = smul.f32 %s764_s14, %s1275_s30  ;;  %s1293_s3 = sld [smem:[#allocation10 + $0x82]] }
  0x56   : > { %v373_v2 = vstv %s372_s18  ;;  %s390_s4 = smul.f32 %s766_s16, %s1275_s30  ;;  %s1298_s5 = sld [smem:[#allocation10 + $0x83]]  ;;  %v370_v3 = vmul.f32 %v369_v0, %v1295_v1 }
  0x57   : > { %v374_v4 = vmul.f32 %v373_v2, %v1295_v1  ;;  %v382_v5 = vstv %s381_s1  ;;  %s1302_s11 = sld [smem:[#allocation11 + %s445_s23]]  ;;  %s496_s18 = sadd.s32 2, %s1281_s21  ;;  %v400_v19 = vstv %s1284_s22 }
  0x58   : > { %v383_v6 = vmul.f32 %v382_v5, %v1295_v1  ;;  %v391_v7 = vstv %s390_s4  ;;  %s1305_s2 = sld [smem:[#allocation12 + %s445_s23]]  ;;  %v406_v20 = vstv %s1287_s20 }
  0x59   : > { %v763_v8 = vrot.slane %v374_v4, 9  ;;  %v392_v9 = vmul.f32 %v391_v7, %v1295_v1  ;;  %s415_s13 = smul.f32 %s769_s25, %s1275_s30  ;;  %s1310_s14 = sld [smem:[#allocation10 + $0x100]] }
  0x5a   : > { %v765_v10 = vrot.slane %v383_v6, 10  ;;  %s419_s1 = smul.f32 %s770_s0, %s1275_s30  ;;  %s1313_s16 = sld [smem:[#allocation10 + $0x101]] }
  0x5b   : > { %v379_v11 = vadd.f32 %v763_v8, %v370_v3  ;;  %v767_v12 = vrot.slane %v392_v9, 11  ;;  %v416_v13 = vstv %s415_s13  ;;  %s428_s4 = smul.f32 %s1293_s3, %s1275_s30  ;;  %s1317_s23 = sld [smem:[#allocation10 + $0x102]] }
  0x5c   : > { %v420_v14 = vstv %s419_s1  ;;  %s437_s24 = smul.f32 %s1298_s5, %s1275_s30  ;;  %s1321_s25 = sld [smem:[#allocation10 + $0x103]]  ;;  %v417_v16 = vmul.f32 %v416_v13, %v1295_v1 }
  0x5d   : > { %v388_v15 = vadd.f32 %v765_v10, %v379_v11  ;;  %v421_v17 = vmul.f32 %v420_v14, %v1295_v1  ;;  %v429_v18 = vstv %s428_s4  ;;  %s1330_s0 = sld [smem:[#allocation11 + %s496_s18]]  ;;  %v447_v36 = vstv %s1302_s11 }
  0x5e   : > { %v430_v21 = vmul.f32 %v429_v18, %v1295_v1  ;;  %v438_v22 = vstv %s437_s24  ;;  %s1335_s5 = sld [smem:[#allocation10 + $0x180]]  ;;  %v455_v37 = vstv %s1305_s2  ;;  %s547_s2 = sadd.s32 3, %s1281_s21 }
  0x5f   : > { %v397_v23 = vadd.f32 %v767_v12, %v388_v15  ;;  %v771_v24 = vrot.slane %v421_v17, 9  ;;  %v439_v25 = vmul.f32 %v438_v22, %v1295_v1  ;;  %s466_s3 = smul.f32 %s1310_s14, %s1275_s30  ;;  %s1339_s20 = sld [smem:[#allocation10 + $0x181]] }
  0x60   : > { %v773_v26 = vrot.slane %v430_v21, 10  ;;  %s470_s22 = smul.f32 %s1313_s16, %s1275_s30  ;;  %s1343_s1 = sld [smem:[#allocation10 + $0x182]] }
  0x61   : > { %v401_v27 = vadd.f32 %v400_v19, %v397_v23  ;;  %v407_v28 = vadd.f32 %v406_v20, %v397_v23  ;;  %v426_v29 = vadd.f32 %v771_v24, %v417_v16  ;;  %v775_v30 = vrot.slane %v439_v25, 11  ;;  %s479_s13 = smul.f32 %s1317_s23, %s1275_s30  ;;  %s1350_s16 = sld [smem:[#allocation10 + $0x183]] }
  0x62   : > { %v467_v32 = vstv %s466_s3  ;;  %v471_v33 = vstv %s470_s22  ;;  %s488_s14 = smul.f32 %s1321_s25, %s1275_s30  ;;  %s1357_s4 = sld [smem:[#allocation12 + %s496_s18]] }
  0x63   : > { %v403_v34 = vmul.f32 %v1346_v31, %v401_v27  ;;  %v435_v35 = vadd.f32 %v773_v26, %v426_v29  ;;  %s1359_s8 = sld [smem:[#allocation2]]  ;;  %v468_v38 = vmul.f32 %v467_v32, %v1295_v1  ;;  %v472_v39 = vmul.f32 %v471_v33, %v1295_v1  ;;  %s1462_s22 = sshll.u32 %s1264_s10, 3 }
  0x64   : > { %v480_v40 = vstv %s479_s13  ;;  %v489_v41 = vstv %s488_s14  ;;  %v408_v42 = vmul.f32 %v407_v28, %v1346_v31  ;;  %s517_s11 = smul.f32 %s1335_s5, %s1275_s30  ;;  %v498_v47 = vstv %s1330_s0  ;;  %s1377_s25 = sld [smem:[#allocation11 + %s547_s2]] }
  0x65   : > { %v444_v43 = vadd.f32 %v775_v30, %v435_v35  ;;  %v481_v44 = vmul.f32 %v480_v40, %v1295_v1  ;;  %v778_v45 = vrot.slane %v472_v39, 9  ;;  %v490_v46 = vmul.f32 %v489_v41, %v1295_v1  ;;  %s521_s18 = smul.f32 %s1339_s20, %s1275_s30  ;;  %s1383_s21 = sld [smem:[#allocation12 + %s547_s2]] }
  0x66   : > { %v404_v48 = vadd.f32 %v403_v34, %v1295_v1  ;;  %s530_s23 = smul.f32 %s1343_s1, %s1275_s30  ;;  %v518_v54 = vstv %s517_s11  ;;  %v409_v56 = vadd.f32 %v408_v42, %v1295_v1  ;;  %s362_s20 = scalar_lea.vmem [#allocation15], %s1462_s22 }
  0x67   : > { %v448_v49 = vadd.f32 %v447_v36, %v444_v43  ;;  %v456_v50 = vadd.f32 %v455_v37, %v444_v43  ;;  %v780_v51 = vrot.slane %v481_v44, 10  ;;  %v477_v52 = vadd.f32 %v778_v45, %v468_v38  ;;  %s539_s24 = smul.f32 %s1350_s16, %s1275_s30  ;;  %s796_s30 = sshll.u32 %s1155_s9, 3 }
  0x68   : > { %v782_v53 = vrot.slane %v490_v46, 11  ;;  %v522_v55 = vstv %s521_s18  ;;  %v519_v59 = vmul.f32 %v518_v54, %v1295_v1  ;;  %v531_v62 = vstv %s530_s23  ;;  %s615_s5 = scalar_lea.hbm %s1444_s7, %s796_s30  ;;  %s617_s13 = sshll.u32 %s362_s20, 4  ;;  %s618_s13 = int_to_ptr.vmem [resolvable:$true] %s617_s13 }
  0x69   : > { %v449_v57 = vmul.f32 %v448_v49, %v1346_v31  ;;  %v457_v58 = vmul.f32 %v456_v50, %v1346_v31  ;;  %v486_v60 = vadd.f32 %v780_v51, %v477_v52  ;;  %v523_v61 = vmul.f32 %v522_v55, %v1295_v1  ;;  %s619_s9 = sshll.u32 %s615_s5, 4  ;;  %s604_s1 = scalar_lea.sflag [#allocation5], %s1264_s10  ;;  %s620_s9 = int_to_ptr.hbm [resolvable:$true] %s619_s9 }
  0x6a   : > { %v540_v63 = vstv %s539_s24  ;;  %v506_v3 = vstv %s1357_s4  ;;  %v532_v4 = vmul.f32 %v531_v62, %v1295_v1  ;;  %v411_v5 = vstv %s1359_s8  ;;  %s1013_s14 = sshra.s32 %s620_s9, 4  ;;  %s1019_s11 = scalar_lea.hbm %s1444_s7, 16  ;;  %s1014_s14 = int_to_ptr.hbm [resolvable:$true] %s1013_s14 }
  0x6b   : > { %v451_v0 = vrot.slane %v449_v57, 7  ;;  %v459_v2 = vrot.slane %v457_v58, 7  ;;  %v495_v6 = vadd.f32 %v782_v53, %v486_v60  ;;  %v785_v7 = vrot.slane %v523_v61, 9  ;;  %s1015_s16 = scalar_lea.hbm %s1014_s14, 8  ;;  %p1020_p12 = scmp.lt.s32.totalorder %s1014_s14, %s1444_s7 }
  0x6c   : > { %v541_v8 = vmul.f32 %v540_v63, %v1295_v1  ;;  %v410_v9 = vsub.f32 %v409_v56, %v404_v48  ;;  %v787_v12 = vrot.slane %v532_v4, 10  ;;  %v549_v22 = vstv %s1377_s25  ;;  %p1016_p1 = scmp.ne.s32.totalorder %s1014_s14, %s1015_s16  ;;  %p1021_p8 = scmp.lt.s32.totalorder %s1019_s11, %s1015_s16 }
  0x6d   : > { %v453_v10 = vadd.f32 %v451_v0, %v1295_v1  ;;  %v461_v11 = vadd.f32 %v459_v2, %v1295_v1  ;;  %v499_v13 = vadd.f32 %v498_v47, %v495_v6  ;;  %v507_v14 = vadd.f32 %v506_v3, %v495_v6 }
  0x6e   : > { %v528_v15 = vadd.f32 %v785_v7, %v519_v59  ;;  %v789_v16 = vrot.slane %v541_v8, 11  ;;  %v412_v21 = vmul.f32 %v411_v5, %v410_v9  ;;  %v557_v23 = vstv %s1383_s21  ;;  %p1017_p3 = pnand %p1016_p1, %p1217_p13  ;;  %p1022_p7 = por %p1021_p8, %p1020_p12 }
  0x6f   : > { %v462_v17 = vsub.f32 %v461_v11, %v453_v10  ;;  %v500_v18 = vmul.f32 %v499_v13, %v1346_v31  ;;  %v508_v19 = vmul.f32 %v507_v14, %v1346_v31 }
  0x70   : > { %v537_v20 = vadd.f32 %v787_v12, %v528_v15  ;;  %v413_v33 = vadd.f32 %v412_v21, %v404_v48  ;;  %p1018_p4 = pneg %p1017_p3 }
  0x71   : > { %v463_v24 = vmul.f32 %v462_v17, %v411_v5  ;;  %v502_v25 = vrot.slane %v500_v18, 6  ;;  %v510_v26 = vrot.slane %v508_v19, 6 }
  0x72   : > { %v546_v27 = vadd.f32 %v789_v16, %v537_v20  ;;  %v568_v41 = vperm.slane %v413_v33, 0  ;;  %v569_v42 = vperm.slane %v413_v33, 4  ;;  %p1023_p9 = pnand %p1022_p7, %p1018_p4 }
  0x73   : > { %v504_v28 = vadd.f32 %v502_v25, %v1295_v1  ;;  %v512_v29 = vadd.f32 %v510_v26, %v1295_v1  ;;  %v464_v34 = vadd.f32 %v463_v24, %v453_v10 }
  0x74   : > { %v550_v30 = vadd.f32 %v549_v22, %v546_v27  ;;  %v558_v32 = vadd.f32 %v557_v23, %v546_v27 }
  0x75   : > { %v513_v35 = vsub.f32 %v512_v29, %v504_v28  ;;  %v573_v43 = vperm.slane %v464_v34, 1  ;;  %v574_v47 = vperm.slane %v464_v34, 5 }
  0x76   : > { %v551_v36 = vmul.f32 %v550_v30, %v1346_v31  ;;  %v559_v37 = vmul.f32 %v558_v32, %v1346_v31 }
  0x77   : > { %v514_v38 = vmul.f32 %v513_v35, %v411_v5  ;;  %v588_v31 = vsel %vm587_vm0, %v568_v41, %v573_v43  ;;  %v589_v52 = vsel %vm587_vm0, %v569_v42, %v574_v47 }
  0x78   : > { %v553_v39 = vrot.slane %v551_v36, 5  ;;  %v561_v40 = vrot.slane %v559_v37, 5 }
  0x79   : > { %v515_v44 = vadd.f32 %v514_v38, %v504_v28 }
  0x7a   : > { %v555_v45 = vadd.f32 %v553_v39, %v1295_v1  ;;  %v563_v46 = vadd.f32 %v561_v40, %v1295_v1 }
  0x7b   : > { %v578_v49 = vperm.slane %v515_v44, 2  ;;  %v579_v50 = vperm.slane %v515_v44, 6 }
  0x7c   : > { %v564_v48 = vsub.f32 %v563_v46, %v555_v45 }
  0x7d   : > { %v591_v54 = vsel %vm590_vm1, %v588_v31, %v578_v49  ;;  %v592_v55 = vsel %vm590_vm1, %v589_v52, %v579_v50 }
  0x7e   : > { %v565_v51 = vmul.f32 %v564_v48, %v411_v5 }
  0x80   : > { %v566_v53 = vadd.f32 %v565_v51, %v555_v45 }
  0x82   : > { %v583_v1 = vperm.slane %v566_v53, 3  ;;  %v584_v56 = vperm.slane %v566_v53, 7 }
  0x84   : > { %v594_v57 = vsel %vm593_vm2, %v591_v54, %v583_v1  ;;  %v595_v58 = vsel %vm593_vm2, %v592_v55, %v584_v56 }
  0x85   : > { %v598_v59 = vrot.slane %v595_v58, 4 }
  0x87   : > { %v600_v60 = vsel %vm599_vm3, %v594_v57, %v598_v59 }
  0x88   : > { %602 = vst [vmem:[%s362_s20] sm:$0xff] %v600_v60 }
  0x89   : > { %1026 = shalt.err (!%p1023_p9)
}
  0x8a   : > { %819 = dma.vmem_to_hbm [thread:$0]  (%p1217_p13), %s618_s13, 128, %s620_s9, %s604_s1  }
  0x8b PF: > { %s631_s10 = sand.u32 1, %s1069_s26   ;;  %p1463_p10 = scmp.ge.s32.totalorder %s1081_s29, 2 }
  0x8c   : > { %s632_s23 = scalar_lea.sflag [#allocation5], %s631_s10 }
  0x8d   : > { %p842_p11 = pnand %p1463_p10, %p1222_p5 }
  0x8f   : > { %p843_p0 = pneg %p842_p11 }
  0x91   : > { %1064 = dma.done.wait (%p843_p0), %s632_s23, 128  }
  0x92   : > { %1066 = vsyncadd (%p843_p0), %s632_s23, 4294967168  ;;  %p25_p2 = scmp.ge.s32.totalorder %s1197_s12, 4   ;;  %s1464_s26 = smov %s1073_s27 }
  0x93   : > { %s1465_s27 = smov %s1077_s28  ;;  %s1466_s28 = smov %s1209_s15 }
  0x94   : > { %s1467_s29 = smov %s1197_s12  ;;  %27 = sbr.rel (!%p25_p2) target bundleno = 16 (0x10), region = 115 }
  0x99   :  { %638 = vsyncpa [#allocation4], 1 }
  0x9a   :  { %640 = vsyncpa [#allocation4 + $0x1], 1 }
  0x9b   :  { %641 = vsyncpa [#allocation5], 1 }
  0x9c   :  { %643 = vsyncpa [#allocation5 + $0x1], 1 }
  0x9d   :  { %644 = vsyncpa [#allocation6], 1 }
  0x9e   :  { %646 = vsyncpa [#allocation6 + $0x1], 1 }
  0x9f   :  { %647 = vsyncpa [#allocation9], 1 }
  0xa0   :  { %648 = vsyncpa [#allocation7], 1 }
  0xa1   :  { %650 = vsyncpa [#allocation7 + $0x1], 1 }
  0xa2   :  { %651 = vsyncpa [#allocation13], 1 }

</bundles_post_ra>
